<compile_context>
chip_gen: v6e
topology: v6e:2x2x1
jax: 0.10.0
libtpu: 0.0.40
codegen_flags: <defaults>
</compile_context>

<pallas_src>
import functools

import jax
import jax.numpy as jnp
from jax.experimental import pallas as pl
from jax.experimental.pallas import tpu as pltpu


def _upsample_nearest_kernel(x_ref, o_ref, *, scale: int):
    """x_ref: (TB, TH, W) -> o_ref: (TB, TH, s*W*s).

    o_ref is the (TB, TH*s, W*s) output row-band with the s identical output
    rows of each input row merged into one lane-contiguous chunk, so a single
    dense store covers the whole block (no strided / masked sublane stores).
    """
    s = scale
    # Column replication along the lane axis (pure data movement, bit-exact).
    xc = jnp.repeat(x_ref[...], s, axis=-1)                # (TB, TH, W*s)
    # Row replication: each output chunk of length s*W*s is s contiguous
    # copies of the column-replicated row -> lane-axis concatenate.
    if s == 1:
        o_ref[...] = xc
    else:
        o_ref[...] = jnp.concatenate([xc] * s, axis=-1)    # (TB, TH, s*W*s)


def _round_up(v: int, m: int) -> int:
    return (v + m - 1) // m * m


def _sublane_multiple(itemsize: int) -> int:
    # Packed dtypes tile more rows per sublane: f32 -> 8, bf16 -> 16, i8 -> 32.
    return max(8, 32 // max(1, itemsize))


def _choose_tiles(B, H, W, s, itemsize, *, budget=4 << 20, target_steps=8):
    """Pick (rows-per-block TH, channels-per-block TB, padded VMEM per channel)."""
    sub = _sublane_multiple(itemsize)
    lane = 128
    sws = s * W * s
    # Padded VMEM bytes per row of one channel (input row + output chunk).
    row_bytes = (_round_up(W, lane) + _round_up(sws, lane)) * itemsize

    # Split H only if one full channel exceeds the per-block budget.
    max_rows = max(sub, (budget // row_bytes) // sub * sub)
    th = H if H <= max_rows else max_rows          # th == H or multiple of sub

    per_ch = _round_up(th, sub) * row_bytes
    tb = max(1, min(B, budget // per_ch))

    # Enough grid steps for DMA/compute overlap and megacore balance
    # (v7x: 2 TCs -> aim for >= 4 steps per core).
    hb = pl.cdiv(H, th)
    if hb * pl.cdiv(B, tb) < target_steps:
        need_bb = min(B, pl.cdiv(target_steps, hb))
        tb = min(tb, pl.cdiv(B, need_bb))
    return int(th), int(tb), int(per_ch)


def upsample_nearest_2d(x, scale_factor: int = 2):
    """Pallas equivalent of F.interpolate(x, scale_factor=s, mode='nearest'), NCHW."""
    s = int(scale_factor)
    assert s >= 1
    N, C, H, W = x.shape
    Hs, Ws = H * s, W * s
    sws = s * Ws
    B = N * C
    itemsize = jnp.dtype(x.dtype).itemsize

    x_flat = x.reshape(B, H, W)                    # contiguous re-view of NCHW

    th, tb, per_ch = _choose_tiles(B, H, W, s, itemsize)
    grid = (pl.cdiv(B, tb), pl.cdiv(H, th))

    # Double-buffered in+out blocks + slack; <= 32 MiB keeps headroom on v7x.
    need = 2 * tb * per_ch
    vmem_limit = min(max(16 << 20, need + (4 << 20)), 32 << 20)
    if need + (2 << 20) > vmem_limit:              # huge-single-channel fallback
        vmem_limit = need + (2 << 20)

    total_bytes = int(x.size) * itemsize * (1 + s * s)

    kernel = functools.partial(_upsample_nearest_kernel, scale=s)
    out = pl.pallas_call(
        kernel,
        out_shape=jax.ShapeDtypeStruct((B, H, sws), x.dtype),
        grid_spec=pltpu.PrefetchScalarGridSpec(
            num_scalar_prefetch=0,
            grid=grid,
            # Input stays (B, H, W): it carries 1/s^2 of the traffic and the
            # structured repeat needs the (H, W) split without risky reshapes.
            in_specs=[pl.BlockSpec((tb, th, W), lambda i, h: (i, h, 0))],
            # Output view (B, H, s*W*s): full-width, lane-dense chunks.
            out_specs=pl.BlockSpec((tb, th, sws), lambda i, h: (i, h, 0)),
        ),
        compiler_params=pltpu.CompilerParams(
            dimension_semantics=("parallel", "parallel"),
            vmem_limit_bytes=int(vmem_limit),
        ),
        cost_estimate=pl.CostEstimate(
            flops=0, transcendentals=0, bytes_accessed=total_bytes),
    )(x_flat)

    # (B, H, s*W*s) is a contiguous re-view of (N, C, H*s, W*s).
    return out.reshape(N, C, Hs, Ws)


if __name__ == "__main__":
    def ref_upsample(x, s=2):
        return jnp.repeat(jnp.repeat(x, s, axis=2), s, axis=3)

    # Case 1: original spec shape (small spatial tile, deep decoder stage).
    x1 = jax.random.normal(jax.random.PRNGKey(0), (2, 4, 16, 16), dtype=jnp.float32)
    y1 = jax.block_until_ready(upsample_nearest_2d(x1, scale_factor=2))
    assert y1.shape == (2, 4, 32, 32), y1.shape
    assert y1.dtype == x1.dtype, y1.dtype
    assert bool(jnp.array_equal(y1, ref_upsample(x1)))   # must be bit-exact

    # Case 2: lane-dense output chunk (s*W*s = 256), many channels, shallow H.
    x2 = jax.random.normal(jax.random.PRNGKey(0), (1, 48, 4, 64), dtype=jnp.float32)
    y2 = jax.block_until_ready(upsample_nearest_2d(x2, scale_factor=2))
    assert y2.shape == (1, 48, 8, 128), y2.shape
    assert bool(jnp.array_equal(y2, ref_upsample(x2)))

    # Case 3: larger channel count -> exercises channel batching and the
    # >= 8 grid-step pipelining/megacore heuristic.
    x3 = jax.random.normal(jax.random.PRNGKey(0), (2, 48, 32, 32), dtype=jnp.float32)
    y3 = jax.block_until_ready(upsample_nearest_2d(x3, scale_factor=2))
    assert y3.shape == (2, 48, 64, 64), y3.shape
    assert bool(jnp.array_equal(y3, ref_upsample(x3)))

    print("KERNEL_OK")
</pallas_src>

<mosaic_0001>
module attributes {stable_mosaic.version = 11 : i64} {
  func.func @_upsample_nearest_kernel(%arg0: i32, %arg1: i32, %arg2: memref<1x16x16xf32, #tpu.memory_space<vmem>>, %arg3: memref<1x16x64xf32, #tpu.memory_space<vmem>>) attributes {dimension_semantics = [#tpu.dimension_semantics<parallel>, #tpu.dimension_semantics<parallel>], iteration_bounds = array<i64: 8, 1>, scalar_prefetch = 0 : i64, scratch_operands = 0 : i64, tpu.core_type = #tpu.core_type<tc>, window_params = [{transform_indices = @transform_0, window_bounds = array<i64: 1, 16, 16>}, {transform_indices = @transform_1, window_bounds = array<i64: 1, 16, 64>}]} {
    %c0 = arith.constant 0 : index
    %c0_0 = arith.constant 0 : index
    %c0_1 = arith.constant 0 : index
    %0 = vector.load %arg2[%c0, %c0_0, %c0_1] : memref<1x16x16xf32, #tpu.memory_space<vmem>>, vector<1x16x16xf32>
    %1 = vector.shape_cast %0 : vector<1x16x16xf32> to vector<1x16x16x1xf32>
    %2 = vector.broadcast %1 : vector<1x16x16x1xf32> to vector<1x16x16x2xf32>
    %3 = vector.shape_cast %2 : vector<1x16x16x2xf32> to vector<1x16x32xf32>
    %4 = tpu.concatenate %3, %3 in 2 : vector<1x16x32xf32>, vector<1x16x32xf32> -> vector<1x16x64xf32>
    %c0_2 = arith.constant 0 : index
    %c0_3 = arith.constant 0 : index
    %c0_4 = arith.constant 0 : index
    %5 = vector.load %arg3[%c0_2, %c0_3, %c0_4] : memref<1x16x64xf32, #tpu.memory_space<vmem>>, vector<1x16x64xf32>
    tpu.vector_store %arg3[%c0_2, %c0_3, %c0_4], %4 {strides = array<i32>} : memref<1x16x64xf32, #tpu.memory_space<vmem>>, vector<1x16x64xf32>,
    return
  }
  func.func @transform_0(%arg0: i32, %arg1: i32) -> (i32, i32, i32) {
    %c0_i32 = arith.constant 0 : i32
    %c0_i32_0 = arith.constant 0 : i32
    return %arg0, %arg1, %c0_i32 : i32, i32, i32
  }
  func.func @transform_1(%arg0: i32, %arg1: i32) -> (i32, i32, i32) {
    %c0_i32 = arith.constant 0 : i32
    %c0_i32_0 = arith.constant 0 : i32
    return %arg0, %arg1, %c0_i32 : i32, i32, i32
  }
}

</mosaic_0001>

<bundles_post_ra>
// kernel: tpu_custom_call.1
= control target key start
LH: loop header
LB: loop body
LE: loop exit
PB: predicated region body
PF: predicated region fallthrough
CT: control target
= control target key end

     0   :  { %6 = vsyncpa [#allocation3], 0  ;;  %s1761_s0 = inlined_call_operand.hbm [shape: f32[8,16,16], index: 0, kind: input, shape index: {}]   ;;  %s1762_s1 = inlined_call_operand.hbm [shape: f32[8,16,64], index: 1, kind: output, shape index: {}]  }
   0x1   :  { %8 = vsyncpa [#allocation3 + $0x1], 0 }
   0x2   :  { %9 = vsyncpa [#allocation4], 0 }
   0x3   :  { %11 = vsyncpa [#allocation4 + $0x1], 0  ;;  %s1402_s6 = smov 0   ;;  %s1404_s7 = smov 0  }
   0x4   :  { %s1406_s8 = smov 0   ;;  %s1408_s9 = smov 0  }
   0x5   :  { %s1410_s10 = smov 0   ;;  %s1412_s11 = smov 0  }
   0x6 LB: > { %s1159_s12 = sadd.s32 4294967295, %s1367_s11   ;;  %s1160_s13 = sadd.s32 4294967294, %s1367_s11   ;;  %s1367_s11 = sphi %s1412_s11, %s17_s11   ;;  %s1363_s10 = sphi %s1410_s10, %s1772_s10   ;;  %s1359_s9 = sphi %s1408_s9, %s1771_s9   ;;  %s1355_s8 = sphi %s1406_s8, %s1770_s8   ;;  %s1351_s7 = sphi %s1404_s7, %s1769_s7   ;;  %s1347_s6 = sphi %s1402_s6, %s1768_s6  }
   0x7   : > { %s29_s14 = sadd.s32 1, %s1363_s10  ;;  %s38_s15 = sadd.s32 1, %s1355_s8 }
   0x8   : > { %p31_p0 = scmp.ge.s32.totalorder %s29_s14, 8  ;;  %p45_p1 = scmp.ne.s32.totalorder %s1355_s8, %s1351_s7 }
   0x9   : > { %p46_p2 = scmp.eq.s32.totalorder %s1367_s11, 0  ;;  %p51_p3 = scmp.ne.s32.totalorder %s1351_s7, %s1347_s6 }
   0xa   : > { %s1774_s14 = smov (%p31_p0, %s29_s14), 0  ;;  %p52_p5 = scmp.eq.s32.totalorder %s1159_s12, 0 }
   0xb   : > { %p1443_p4 = por %p46_p2, %p45_p1  ;;  %s33_s17 = ssub.s32 %s1363_s10, %s1774_s14 }
   0xc   : > { %p77_p6 = scmp.eq.s32.totalorder %s1159_s12, 7  ;;  %p36_p7 = scmp.eq.s32.totalorder %s33_s17, 0 }
   0xd   : > { %p1449_p8 = por %p52_p5, %p51_p3  ;;  %p83_p10 = scmp.eq.s32.totalorder %s1160_s13, 7 }
   0xe   : > { %p1453_p9 = por %p77_p6, %p45_p1  ;;  %p1188_p12 = scmp.lt.s32.totalorder %s1367_s11, 8 }
   0xf   : > { %s1458_s20 = scalar_select %p36_p7, %s1355_s8, %s38_s15  }
  0x10   : > { %p1460_p11 = por %p83_p10, %p51_p3  ;;  %s103_s22 = sand.u32 1, %s1355_s8  }
  0x11   : > { %s1163_s23 = sshll.u32 %s103_s22, 4  ;;  %s1174_s24 = sshll.u32 %s1363_s10, 8 }
  0x12   : > { %s115_s27 = scalar_lea.hbm %s1761_s0, %s1174_s24  ;;  %s107_s28 = scalar_lea.vmem [#allocation2], %s1163_s23 }
  0x13   : > { %s116_s29 = sshll.u32 %s107_s28, 4  ;;  %p1472_p13 = pnand %p1188_p12, %p1443_p4  ;;  %s117_s29 = int_to_ptr.vmem [resolvable:$true] %s116_s29 }
  0x14   : > { %p1166_p0 = scmp.ge.s32.totalorder %s1367_s11, 1  ;;  %s104_s2 = scalar_lea.sflag [#allocation3], %s103_s22 }
  0x15   : > { %p1261_p1 = pneg %p1472_p13  ;;  %s1272_s3 = scalar_lea.vmem %s117_s29, 256 }
  0x16   : > { %p1273_p2 = scmp.ne.s32.totalorder %s117_s29, %s1272_s3  ;;  %s1369_s4 = smov [#allocation2]  }
  0x17   : > { %s1277_s5 = sshll.u32 %s1369_s4, 4  ;;  %s1278_s5 = int_to_ptr.vmem [resolvable:$false] %s1277_s5 }
  0x18   : > { %p1275_p3 = pnand %p1273_p2, %p1261_p1  ;;  %s1279_s12 = scalar_lea.vmem %s1278_s5, 512 }
  0x19   : > { %p1280_p6 = scmp.lt.s32.totalorder %s117_s29, %s1278_s5  ;;  %p1281_p7 = scmp.lt.s32.totalorder %s1279_s12, %s1272_s3 }
  0x1a   : > { %p1276_p5 = pneg %p1275_p3 }
  0x1b   : > { %p1282_p10 = por %p1281_p7, %p1280_p6 }
  0x1d   : > { %p1283_p4 = pnand %p1282_p10, %p1276_p5 }
  0x1f   : > { %1286 = shalt.err (!%p1283_p4)
}
  0x20   : > { %s1370_s13 = smov 128   ;;  %s1371_s15 = smov 8  }
  0x21   : > { %1183 = dma.hbm_to_vmem [thread:$0]  (!%p1472_p13), %s115_s27, 256, %s117_s29, %s104_s2, %s1370_s13, %s1370_s13, %s1371_s15  }
  0x22   : > { %p124_p12 = scmp.lt.s32.totalorder %s1367_s11, 9 }
  0x24   : > { %p125_p1 = pnand %p1166_p0, %p124_p12 }
  0x25   : > { %s1485_s16 = sand.u32 (!%p125_p1), 1, %s1351_s7  }
  0x26   : > { %128 = sbr.rel (%p125_p1) target bundleno = 511 (0x1ff), region = 24  ;;  %s1167_s17 = sshll.u32 (!%p125_p1), %s1485_s16, 4 }
  0x27   : > { %s131_s22 = scalar_lea.sflag (!%p125_p1), [#allocation3], %s1485_s16  ;;  %s134_s23 = scalar_lea.vmem (!%p125_p1), [#allocation2], %s1167_s17 }
  0x2b   : > { %1338 = dma.done.wait (%p1449_p8), %s131_s22, 256  }
  0x2c   : > { %1340 = vsyncadd (%p1449_p8), %s131_s22, 4294967040  ;;  %v157_v0 = vlaneseq  ;;  %v155_v6 = vld [vmem:[%s134_s23] sm:$0xff]  ;;  %v156_v19 = vld [vmem:[%s134_s23 + $0x8] sm:$0xff]  ;;  %v1372_v30 = vmov 1983009808   ;;  %s1374_s18 = smov 2  }
  0x2d   : > { %v336_v31 = vunpack.c.l.s4 %v1372_v30  ;;  %v1373_v35 = vmov 1934713408   ;;  %s1375_s24 = smov 4   ;;  %s1376_s25 = smov 6   ;;  %vm997_vm0 = vcmask 15360   ;;  %vm1000_vm1 = vcmask 31744  }
  0x2e   : > { %v1495_v1 = vshrl.u32 %v157_v0, 7  ;;  %v400_v36 = vunpack.c.l.s4 %v1373_v35  ;;  %s1377_s26 = smov 8   ;;  %s1378_s27 = smov 10   ;;  %vm1003_vm2 = vcmask 48128   ;;  %vm1006_vm3 = vcmask 64512  }
  0x2f   : > { %v337_v34 = vunpack.c.0.s8 %v336_v31  ;;  %s1379_s28 = smov 12   ;;  %s1380_s29 = smov 14   ;;  %vm1009_vm4 = vcmask 80896   ;;  %vm1012_vm5 = vcmask 97280   ;;  %vm1015_vm6 = vcmask 113664  }
  0x30   : > { %v181_v2 = vsub.s32 2, %v1495_v1  ;;  %v159_v3 = vsub.s32 0, %v1495_v1  ;;  %v192_v4 = vsub.s32 3, %v1495_v1  ;;  %v170_v5 = vsub.s32 1, %v1495_v1  ;;  %s1381_s30 = smov 16   ;;  %s1382_s2 = smov 18  }
  0x31   : > { %v214_v11 = vsub.s32 5, %v1495_v1  ;;  %v203_v12 = vsub.s32 4, %v1495_v1  ;;  %v236_v15 = vsub.s32 7, %v1495_v1  ;;  %v225_v16 = vsub.s32 6, %v1495_v1  ;;  %s1383_s3 = smov 20   ;;  %s1384_s4 = smov 22  }
  0x32   : > { %v182_v7 = vrot.slane %v155_v6, %v181_v2  ;;  %v160_v8 = vrot.slane %v155_v6, %v159_v3  ;;  %v193_v9 = vrot.slane %v155_v6, %v192_v4  ;;  %v171_v10 = vrot.slane %v155_v6, %v170_v5  ;;  %s1385_s5 = smov 24   ;;  %s1386_s12 = smov 26  }
  0x33   : > { %v215_v13 = vrot.slane %v155_v6, %v214_v11  ;;  %v204_v14 = vrot.slane %v155_v6, %v203_v12  ;;  %v237_v17 = vrot.slane %v155_v6, %v236_v15  ;;  %v226_v18 = vrot.slane %v155_v6, %v225_v16  ;;  %s1387_s13 = smov 28   ;;  %s1388_s15 = smov 30  }
  0x34   : > { %184 = vbcast.lane.b32.xlu1 %v182_v7, 256  ;;  %162 = vbcast.lane.b32.xlu0 %v160_v8, 256  ;;  %v259_v20 = vrot.slane %v156_v19, %v170_v5  ;;  %v248_v21 = vrot.slane %v156_v19, %v159_v3  ;;  %v281_v22 = vrot.slane %v156_v19, %v192_v4  ;;  %v401_v42 = vunpack.c.0.s8 %v400_v36  ;;  %s1389_s22 = smov 32   ;;  %s152_s23 = scalar_lea.vmem [#allocation5], %s1167_s17 }
  0x35   : > { %v270_v23 = vrot.slane %v156_v19, %v181_v2  ;;  %v303_v24 = vrot.slane %v156_v19, %v214_v11  ;;  %v292_v25 = vrot.slane %v156_v19, %v203_v12  ;;  %v325_v26 = vrot.slane %v156_v19, %v236_v15 }
  0x36   : > { %v314_v27 = vrot.slane %v156_v19, %v225_v16  ;;  %v1506_v40 = vsub.s32 %v337_v34, %v1495_v1  ;;  %v1513_v51 = vsub.s32 %v401_v42, %v1495_v1  ;;  %vm1018_vm7 = vcmask 130048  }
  0x37   : > { %vm1021_vm8 = vcmask 146432   ;;  %vm1024_vm9 = vcmask 162816   ;;  %vm1027_vm10 = vcmask 179200   ;;  %vm1030_vm11 = vcmask 195584  }
  0x38   : > { %195 = vbcast.lane.b32.xlu1 %v193_v9, 256  ;;  %173 = vbcast.lane.b32.xlu0 %v171_v10, 256  ;;  %vm1033_vm12 = vcmask 211968   ;;  %vm1036_vm13 = vcmask 228352   ;;  %vm1039_vm14 = vcmask 244736   ;;  %vm1050_vm15 = vcmask 261120  }
  0x3c   : > { %217 = vbcast.lane.b32.xlu1 %v215_v13, 256  ;;  %206 = vbcast.lane.b32.xlu0 %v204_v14, 256 }
  0x40   : > { %239 = vbcast.lane.b32.xlu1 %v237_v17, 256  ;;  %228 = vbcast.lane.b32.xlu0 %v226_v18, 256 }
  0x44   : > { %261 = vbcast.lane.b32.xlu1 %v259_v20, 256  ;;  %250 = vbcast.lane.b32.xlu0 %v248_v21, 256 }
  0x48   : > { %283 = vbcast.lane.b32.xlu1 %v281_v22, 256  ;;  %272 = vbcast.lane.b32.xlu0 %v270_v23, 256 }
  0x4c   : > { %305 = vbcast.lane.b32.xlu1 %v303_v24, 256  ;;  %294 = vbcast.lane.b32.xlu0 %v292_v25, 256 }
  0x50   : > { %327 = vbcast.lane.b32.xlu1 %v325_v26, 256  ;;  %316 = vbcast.lane.b32.xlu0 %v314_v27, 256 }
  0x54   : > { %177 = vbcast.lane.b32.xlu1 %v171_v10, 264  ;;  %166 = vbcast.lane.b32.xlu0 %v160_v8, 264 }
  0x58   : > { %199 = vbcast.lane.b32.xlu1 %v193_v9, 264  ;;  %188 = vbcast.lane.b32.xlu0 %v182_v7, 264 }
  0x5c   : > { %221 = vbcast.lane.b32.xlu1 %v215_v13, 264  ;;  %210 = vbcast.lane.b32.xlu0 %v204_v14, 264 }
  0x60   : > { %243 = vbcast.lane.b32.xlu1 %v237_v17, 264  ;;  %232 = vbcast.lane.b32.xlu0 %v226_v18, 264 }
  0x64   : > { %265 = vbcast.lane.b32.xlu1 %v259_v20, 264  ;;  %254 = vbcast.lane.b32.xlu0 %v248_v21, 264 }
  0x68   : > { %287 = vbcast.lane.b32.xlu1 %v281_v22, 264  ;;  %276 = vbcast.lane.b32.xlu0 %v270_v23, 264 }
  0x6c   : > { %309 = vbcast.lane.b32.xlu1 %v303_v24, 264  ;;  %298 = vbcast.lane.b32.xlu0 %v292_v25, 264 }
  0x70   : > { %331 = vbcast.lane.b32.xlu1 %v325_v26, 264  ;;  %320 = vbcast.lane.b32.xlu0 %v314_v27, 264 }
  0xa6   : > { %v185_v28 = vpop.permute.xlu1 %184  ;;  %v163_v29 = vpop.permute.xlu0 %162 }
  0xa7   : > { %v333_v41 = vcombine.low %v163_v29, %v185_v28  ;;  %v334_v1 = vcombine.high %v163_v29, %v185_v28 }
  0xa9   : > { %v341_v48 = vrot.slane %v333_v41, %v1506_v40  ;;  %v348_v13 = vrot.slane %v334_v1, %v1506_v40 }
  0xaa   : > { %v196_v32 = vpop.permute.xlu1 %195  ;;  %v174_v33 = vpop.permute.xlu0 %173 }
  0xab   : > { %v349_v37 = vcombine.low %v174_v33, %v196_v32  ;;  %v350_v59 = vcombine.high %v174_v33, %v196_v32 }
  0xad   : > { %v357_v43 = vrot.slane %v349_v37, %v1506_v40  ;;  %v364_v6 = vrot.slane %v350_v59, %v1506_v40 }
  0xae   : > { %v218_v38 = vpop.permute.xlu1 %217  ;;  %v207_v39 = vpop.permute.xlu0 %206 }
  0xaf   : > { %v397_v52 = vcombine.low %v341_v48, %v357_v43  ;;  %v398_v61 = vcombine.high %v341_v48, %v357_v43  ;;  %v413_v16 = vcombine.low %v348_v13, %v364_v6  ;;  %v414_v37 = vcombine.high %v348_v13, %v364_v6 }
  0xb1   : > { %v1523_v0 = vrot.slane %v397_v52, %v1513_v51  ;;  %v412_v11 = vrot.slane %v398_v61, %v1513_v51  ;;  %v421_v30 = vrot.slane %v413_v16, %v1513_v51 }
  0xb2   : > { %v240_v44 = vpop.permute.xlu1 %239  ;;  %v229_v45 = vpop.permute.xlu0 %228 }
  0xb3   : > { %v381_v46 = vcombine.low %v218_v38, %v240_v44  ;;  %v365_v47 = vcombine.low %v207_v39, %v229_v45  ;;  %v382_v56 = vcombine.high %v218_v38, %v240_v44  ;;  %v366_v57 = vcombine.high %v207_v39, %v229_v45 }
  0xb5   : > { %v389_v49 = vrot.slane %v381_v46, %v1506_v40  ;;  %v373_v50 = vrot.slane %v365_v47, %v1506_v40  ;;  %v396_v2 = vrot.slane %v382_v56, %v1506_v40  ;;  %v380_v3 = vrot.slane %v366_v57, %v1506_v40 }
  0xb6   : > { %v1515_v53 = vpop.permute.xlu1 %261  ;;  %v1517_v54 = vpop.permute.xlu0 %250 }
  0xb7   : > { %v429_v55 = vcombine.low %v373_v50, %v389_v49  ;;  %v430_v58 = vcombine.high %v373_v50, %v389_v49  ;;  %v445_v14 = vcombine.low %v380_v3, %v396_v2  ;;  %v446_v31 = vcombine.high %v380_v3, %v396_v2 }
  0xb9   : > { %v1520_v60 = vrot.slane %v429_v55, %v1513_v51  ;;  %v444_v5 = vrot.slane %v430_v58, %v1513_v51  ;;  %v453_v24 = vrot.slane %v445_v14, %v1513_v51  ;;  %v460_v47 = vrot.slane %v446_v31, %v1513_v51 }
  0xba   : > { %v284_v62 = vpop.permute.xlu1 %283  ;;  %v273_v63 = vpop.permute.xlu0 %272  ;;  %v428_v55 = vrot.slane %v414_v37, %v1513_v51 }
  0xbb   : > { %v462_v4 = vcombine.high %v1523_v0, %v1520_v60  ;;  %v485_v7 = vcombine.low %v1515_v53, %v284_v62  ;;  %v469_v8 = vcombine.low %v1517_v54, %v273_v63  ;;  %v461_v12 = vcombine.low %v1523_v0, %v1520_v60 }
  0xbc   : > { %v463_v15 = vcombine.low %v412_v11, %v444_v5  ;;  %v464_v23 = vcombine.high %v412_v11, %v444_v5  ;;  %v465_v36 = vcombine.low %v421_v30, %v453_v24  ;;  %v486_v38 = vcombine.high %v1515_v53, %v284_v62 }
  0xbd   : > { %879 = vrot.lane.b32.xlu0 %v462_v4, %s1374_s18  ;;  %v493_v17 = vrot.slane %v485_v7, %v1506_v40  ;;  %v477_v18 = vrot.slane %v469_v8, %v1506_v40  ;;  %v470_v39 = vcombine.high %v1517_v54, %v273_v63  ;;  %v466_v46 = vcombine.high %v421_v30, %v453_v24 }
  0xbe   : > { %v306_v9 = vpop.permute.xlu1 %305  ;;  %v295_v10 = vpop.permute.xlu0 %294  ;;  %v500_v53 = vrot.slane %v486_v38, %v1506_v40  ;;  %v467_v63 = vcombine.low %v428_v55, %v460_v47 }
  0xbf   : > { %v533_v27 = vcombine.low %v477_v18, %v493_v17  ;;  %v534_v42 = vcombine.high %v477_v18, %v493_v17  ;;  %v484_v54 = vrot.slane %v470_v39, %v1506_v40 }
  0xc1   : > { %887 = vrot.lane.b32.xlu0 %v463_v15, %s1375_s24  ;;  %v1561_v45 = vrot.slane %v533_v27, %v1513_v51  ;;  %v548_v61 = vrot.slane %v534_v42, %v1513_v51  ;;  %v549_v3 = vcombine.low %v484_v54, %v500_v53 }
  0xc2   : > { %v328_v19 = vpop.permute.xlu1 %327  ;;  %v317_v20 = vpop.permute.xlu0 %316 }
  0xc3   : > { %v517_v21 = vcombine.low %v306_v9, %v328_v19  ;;  %v501_v22 = vcombine.low %v295_v10, %v317_v20  ;;  %v518_v33 = vcombine.high %v306_v9, %v328_v19  ;;  %v502_v34 = vcombine.high %v295_v10, %v317_v20 }
  0xc4   : > { %v468_v10 = vcombine.high %v428_v55, %v460_v47  ;;  %v557_v20 = vrot.slane %v549_v3, %v1513_v51 }
  0xc5   : > { %v525_v25 = vrot.slane %v517_v21, %v1506_v40  ;;  %v509_v26 = vrot.slane %v501_v22, %v1506_v40  ;;  %895 = vrot.lane.b32.xlu0 %v464_v23, %s1376_s25  ;;  %v532_v48 = vrot.slane %v518_v33, %v1506_v40  ;;  %v516_v49 = vrot.slane %v502_v34, %v1506_v40 }
  0xc6   : > { %v1545_v28 = vpop.permute.xlu1 %177  ;;  %v1547_v29 = vpop.permute.xlu0 %166  ;;  %v550_v23 = vcombine.high %v484_v54, %v500_v53 }
  0xc7   : > { %v565_v32 = vcombine.low %v509_v26, %v525_v25  ;;  %v566_v35 = vcombine.high %v509_v26, %v525_v25  ;;  %v581_v62 = vcombine.low %v516_v49, %v532_v48  ;;  %v582_v16 = vcombine.high %v516_v49, %v532_v48 }
  0xc8   : > { %v564_v48 = vrot.slane %v550_v23, %v1513_v51 }
  0xc9   : > { %v1553_v41 = vrot.slane %v565_v32, %v1513_v51  ;;  %903 = vrot.lane.b32.xlu0 %v465_v36, %s1377_s26  ;;  %v580_v52 = vrot.slane %v566_v35, %v1513_v51  ;;  %v589_v13 = vrot.slane %v581_v62, %v1513_v51  ;;  %v596_v33 = vrot.slane %v582_v16, %v1513_v51 }
  0xca   : > { %v1556_v43 = vpop.permute.xlu1 %199  ;;  %v1558_v44 = vpop.permute.xlu0 %188 }
  0xcb   : > { %v598_v50 = vcombine.high %v1561_v45, %v1553_v41  ;;  %v621_v56 = vcombine.low %v1545_v28, %v1556_v43  ;;  %v605_v57 = vcombine.low %v1547_v29, %v1558_v44  ;;  %v599_v1 = vcombine.low %v548_v61, %v580_v52 }
  0xcc   : > { %v597_v2 = vcombine.low %v1561_v45, %v1553_v41  ;;  %v600_v11 = vcombine.high %v548_v61, %v580_v52  ;;  %v601_v22 = vcombine.low %v557_v20, %v589_v13  ;;  %v622_v24 = vcombine.high %v1545_v28, %v1556_v43 }
  0xcd   : > { %911 = vrot.lane.b32.xlu0 %v466_v46, %s1378_s27  ;;  %881 = vrot.lane.b32.xlu1 %v598_v50, %s1374_s18  ;;  %v1582_v4 = vrot.slane %v621_v56, %v1506_v40  ;;  %v1585_v5 = vrot.slane %v605_v57, %v1506_v40  ;;  %v606_v34 = vcombine.high %v1547_v29, %v1558_v44  ;;  %s1072_s18 = sshll.u32 %s152_s23, 4  ;;  %s1708_s18 = int_to_ptr.vmem [resolvable:$true] %s1072_s18 }
  0xce   : > { %v222_v58 = vpop.permute.xlu1 %221  ;;  %v211_v59 = vpop.permute.xlu0 %210  ;;  %v602_v37 = vcombine.high %v557_v20, %v589_v13  ;;  %v1606_v43 = vrot.slane %v622_v24, %v1506_v40  ;;  %v603_v56 = vcombine.low %v564_v48, %v596_v33  ;;  %v604_v13 = vcombine.high %v564_v48, %v596_v33 }
  0xcf   : > { %v669_v17 = vcombine.low %v1585_v5, %v1582_v4  ;;  %v670_v49 = vcombine.high %v1585_v5, %v1582_v4  ;;  %v1622_v53 = vrot.slane %v606_v34, %v1506_v40 }
  0xd1   : > { %919 = vrot.lane.b32.xlu0 %v467_v63, %s1379_s28  ;;  %889 = vrot.lane.b32.xlu1 %v599_v1, %s1375_s24  ;;  %v677_v32 = vrot.slane %v669_v17, %v1513_v51  ;;  %v684_v5 = vrot.slane %v670_v49, %v1513_v51  ;;  %s1175_s24 = sshll.u32 %s1359_s9, 8  ;;  %s1390_s9 = smov [#allocation5]  }
  0xd2   : > { %v244_v6 = vpop.permute.xlu1 %243  ;;  %v233_v7 = vpop.permute.xlu0 %232  ;;  %s1291_s17 = sshll.u32 %s1390_s9, 4  ;;  %s1292_s17 = int_to_ptr.vmem [resolvable:$false] %s1291_s17 }
  0xd3   : > { %v653_v8 = vcombine.low %v222_v58, %v244_v6  ;;  %v637_v9 = vcombine.low %v211_v59, %v233_v7  ;;  %v654_v26 = vcombine.high %v222_v58, %v244_v6  ;;  %v638_v27 = vcombine.high %v211_v59, %v233_v7  ;;  %p1294_p2 = scmp.lt.s32.totalorder %s1708_s18, %s1292_s17 }
  0xd5   : > { %v661_v14 = vrot.slane %v653_v8, %v1506_v40  ;;  %v645_v15 = vrot.slane %v637_v9, %v1506_v40  ;;  %927 = vrot.lane.b32.xlu0 %v468_v10, %s1380_s29  ;;  %897 = vrot.lane.b32.xlu1 %v600_v11, %s1376_s25  ;;  %v1614_v29 = vrot.slane %v654_v26, %v1506_v40 }
  0xd6   : > { %v266_v18 = vpop.permute.xlu1 %265  ;;  %v255_v19 = vpop.permute.xlu0 %254  ;;  %v1617_v44 = vrot.slane %v638_v27, %v1506_v40  ;;  %v685_v10 = vcombine.low %v1622_v53, %v1606_v43 }
  0xd7   : > { %v701_v21 = vcombine.low %v645_v15, %v661_v14  ;;  %v702_v38 = vcombine.high %v645_v15, %v661_v14 }
  0xd8   : > { %v717_v1 = vcombine.low %v1617_v44, %v1614_v29  ;;  %v693_v24 = vrot.slane %v685_v10, %v1513_v51 }
  0xd9   : > { %v709_v25 = vrot.slane %v701_v21, %v1513_v51  ;;  %905 = vrot.lane.b32.xlu1 %v601_v22, %s1377_s26  ;;  %v716_v61 = vrot.slane %v702_v38, %v1513_v51 }
  0xda   : > { %v288_v30 = vpop.permute.xlu1 %287  ;;  %v277_v31 = vpop.permute.xlu0 %276  ;;  %v725_v22 = vrot.slane %v717_v1, %v1513_v51 }
  0xdb   : > { %v758_v35 = vcombine.high %v266_v18, %v288_v30  ;;  %v742_v36 = vcombine.high %v255_v19, %v277_v31  ;;  %v757_v28 = vcombine.low %v266_v18, %v288_v30  ;;  %v741_v39 = vcombine.low %v255_v19, %v277_v31 }
  0xdc   : > { %v733_v42 = vcombine.low %v677_v32, %v709_v25  ;;  %v734_v59 = vcombine.high %v677_v32, %v709_v25  ;;  %v735_v14 = vcombine.low %v684_v5, %v716_v61  ;;  %v736_v23 = vcombine.high %v684_v5, %v716_v61 }
  0xdd   : > { %v772_v46 = vrot.slane %v758_v35, %v1506_v40  ;;  %v756_v47 = vrot.slane %v742_v36, %v1506_v40  ;;  %913 = vrot.lane.b32.xlu1 %v602_v37, %s1378_s27  ;;  %v765_v57 = vrot.slane %v757_v28, %v1506_v40  ;;  %v749_v58 = vrot.slane %v741_v39, %v1506_v40 }
  0xde   : > { %935 = vrot.lane.b32.xlu0 %v733_v42, %s1381_s30  ;;  %v310_v50 = vpop.permute.xlu1 %309  ;;  %v299_v52 = vpop.permute.xlu0 %298  ;;  %v718_v30 = vcombine.high %v1617_v44, %v1614_v29  ;;  %v737_v32 = vcombine.low %v693_v24, %v725_v22  ;;  %v686_v28 = vcombine.high %v1622_v53, %v1606_v43 }
  0xdf   : > { %v821_v54 = vcombine.low %v756_v47, %v772_v46  ;;  %v822_v55 = vcombine.high %v756_v47, %v772_v46  ;;  %v805_v11 = vcombine.low %v749_v58, %v765_v57  ;;  %v806_v38 = vcombine.high %v749_v58, %v765_v57 }
  0xe0   : > { %v738_v46 = vcombine.high %v693_v24, %v725_v22  ;;  %v732_v47 = vrot.slane %v718_v30, %v1513_v51  ;;  %v700_v49 = vrot.slane %v686_v28, %v1513_v51 }
  0xe1   : > { %v1628_v62 = vrot.slane %v821_v54, %v1513_v51  ;;  %v1631_v63 = vrot.slane %v822_v55, %v1513_v51  ;;  %921 = vrot.lane.b32.xlu1 %v603_v56, %s1379_s28  ;;  %v813_v25 = vrot.slane %v805_v11, %v1513_v51  ;;  %v820_v48 = vrot.slane %v806_v38, %v1513_v51  ;;  %s1713_s28 = scalar_lea.hbm %s1762_s1, %s1175_s24 }
  0xe2   : > { %943 = vrot.lane.b32.xlu0 %v734_v59, %s1382_s2  ;;  %v332_v3 = vpop.permute.xlu1 %331  ;;  %v321_v4 = vpop.permute.xlu0 %320  ;;  %v739_v44 = vcombine.low %v700_v49, %v732_v47 }
  0xe3   : > { %v789_v6 = vcombine.low %v310_v50, %v332_v3  ;;  %v790_v7 = vcombine.high %v310_v50, %v332_v3  ;;  %v773_v8 = vcombine.low %v299_v52, %v321_v4  ;;  %v774_v9 = vcombine.high %v299_v52, %v321_v4 }
  0xe4   : > { %v740_v50 = vcombine.high %v700_v49, %v732_v47 }
  0xe5   : > { %v797_v15 = vrot.slane %v789_v6, %v1506_v40  ;;  %v804_v16 = vrot.slane %v790_v7, %v1506_v40  ;;  %v781_v17 = vrot.slane %v773_v8, %v1506_v40  ;;  %v788_v18 = vrot.slane %v774_v9, %v1506_v40  ;;  %929 = vrot.lane.b32.xlu1 %v604_v13, %s1380_s29  ;;  %s1057_s29 = scalar_lea.sflag [#allocation4], %s1485_s16 }
  0xe6   : > { %951 = vrot.lane.b32.xlu0 %v735_v14, %s1383_s3 }
  0xe7   : > { %v837_v19 = vcombine.low %v781_v17, %v797_v15  ;;  %v853_v20 = vcombine.low %v788_v18, %v804_v16  ;;  %v854_v21 = vcombine.high %v788_v18, %v804_v16  ;;  %v838_v31 = vcombine.high %v781_v17, %v797_v15 }
  0xe9   : > { %v845_v26 = vrot.slane %v837_v19, %v1513_v51  ;;  %v861_v27 = vrot.slane %v853_v20, %v1513_v51  ;;  %v868_v40 = vrot.slane %v854_v21, %v1513_v51  ;;  %v852_v42 = vrot.slane %v838_v31, %v1513_v51 }
  0xea   : > { %959 = vrot.lane.b32.xlu0 %v736_v23, %s1384_s4 }
  0xeb   : > { %v869_v33 = vcombine.low %v813_v25, %v845_v26  ;;  %v873_v34 = vcombine.low %v1628_v62, %v861_v27  ;;  %v874_v35 = vcombine.high %v1628_v62, %v861_v27  ;;  %v875_v36 = vcombine.low %v1631_v63, %v868_v40 }
  0xec   : > { %v876_v37 = vcombine.high %v1631_v63, %v868_v40  ;;  %v870_v39 = vcombine.high %v813_v25, %v845_v26  ;;  %v871_v29 = vcombine.low %v820_v48, %v852_v42  ;;  %v872_v43 = vcombine.high %v820_v48, %v852_v42 }
  0xed   : > { %937 = vrot.lane.b32.xlu1 %v869_v33, %s1381_s30  ;;  %s1287_s30 = scalar_lea.vmem %s1708_s18, 256 }
  0xee   : > { %967 = vrot.lane.b32.xlu0 %v737_v32, %s1385_s5  ;;  %p1288_p8 = scmp.ne.s32.totalorder %s1708_s18, %s1287_s30 }
  0xf0   : > { %p1289_p13 = pnand %p1288_p8, %p1453_p9 }
  0xf1   : > { %945 = vrot.lane.b32.xlu1 %v870_v39, %s1382_s2  ;;  %s1293_s2 = scalar_lea.vmem %s1292_s17, 512 }
  0xf2   : > { %975 = vrot.lane.b32.xlu0 %v738_v46, %s1386_s12  ;;  %p1290_p0 = pneg %p1289_p13  ;;  %p1295_p3 = scmp.lt.s32.totalorder %s1293_s2, %s1287_s30 }
  0xf4   : > { %p1296_p5 = por %p1295_p3, %p1294_p2 }
  0xf5   : > { %953 = vrot.lane.b32.xlu1 %v871_v29, %s1383_s3 }
  0xf6   : > { %983 = vrot.lane.b32.xlu0 %v739_v44, %s1387_s13  ;;  %p1297_p6 = pnand %p1296_p5, %p1290_p0 }
  0xf9   : > { %961 = vrot.lane.b32.xlu1 %v872_v43, %s1384_s4 }
  0xfa   : > { %991 = vrot.lane.b32.xlu0 %v740_v50, %s1388_s15 }
  0xfd   : > { %969 = vrot.lane.b32.xlu1 %v873_v34, %s1385_s5 }
 0x101   : > { %977 = vrot.lane.b32.xlu1 %v874_v35, %s1386_s12 }
 0x105   : > { %985 = vrot.lane.b32.xlu1 %v875_v36, %s1387_s13 }
 0x109   : > { %993 = vrot.lane.b32.xlu1 %v876_v37, %s1388_s15 }
 0x12f   : > { %v880_v52 = vpop.permute.xlu0 %879 }
 0x130   : > { %v998_v8 = vsel %vm997_vm0, %v461_v12, %v880_v52 }
 0x133   : > { %v888_v53 = vpop.permute.xlu0 %887 }
 0x134   : > { %v1001_v10 = vsel %vm1000_vm1, %v998_v8, %v888_v53 }
 0x137   : > { %v896_v54 = vpop.permute.xlu0 %895 }
 0x138   : > { %v1004_v13 = vsel %vm1003_vm2, %v1001_v10, %v896_v54 }
 0x13b   : > { %v904_v51 = vpop.permute.xlu0 %903 }
 0x13c   : > { %v1007_v14 = vsel %vm1006_vm3, %v1004_v13, %v904_v51 }
 0x13f   : > { %v882_v55 = vpop.permute.xlu1 %881  ;;  %v912_v56 = vpop.permute.xlu0 %911 }
 0x140   : > { %v1010_v15 = vsel %vm1009_vm4, %v1007_v14, %v912_v56  ;;  %v999_v30 = vsel %vm997_vm0, %v597_v2, %v882_v55  ;;  %vm1053_vm0 = vcmask 523264  }
 0x143   : > { %v890_v57 = vpop.permute.xlu1 %889  ;;  %v920_v58 = vpop.permute.xlu0 %919 }
 0x144   : > { %v1013_v60 = vsel %vm1012_vm5, %v1010_v15, %v920_v58  ;;  %v1002_v31 = vsel %vm1000_vm1, %v999_v30, %v890_v57 }
 0x147   : > { %v898_v59 = vpop.permute.xlu1 %897  ;;  %v928_v61 = vpop.permute.xlu0 %927 }
 0x148   : > { %v1016_v12 = vsel %vm1015_vm6, %v1013_v60, %v928_v61  ;;  %v1005_v33 = vsel %vm1003_vm2, %v1002_v31, %v898_v59 }
 0x14b   : > { %v906_v62 = vpop.permute.xlu1 %905 }
 0x14c   : > { %v1008_v34 = vsel %vm1006_vm3, %v1005_v33, %v906_v62 }
 0x14f   : > { %v914_v63 = vpop.permute.xlu1 %913 }
 0x150   : > { %v936_v1 = vpop.permute.xlu0 %935  ;;  %v1011_v35 = vsel %vm1009_vm4, %v1008_v34, %v914_v63 }
 0x151   : > { %v1019_v17 = vsel %vm1018_vm7, %v1016_v12, %v936_v1 }
 0x153   : > { %v922_v4 = vpop.permute.xlu1 %921 }
 0x154   : > { %v944_v3 = vpop.permute.xlu0 %943  ;;  %v1014_v36 = vsel %vm1012_vm5, %v1011_v35, %v922_v4 }
 0x155   : > { %v1022_v18 = vsel %vm1021_vm8, %v1019_v17, %v944_v3 }
 0x157   : > { %v930_v6 = vpop.permute.xlu1 %929 }
 0x158   : > { %v952_v5 = vpop.permute.xlu0 %951  ;;  %v1017_v38 = vsel %vm1015_vm6, %v1014_v36, %v930_v6 }
 0x159   : > { %v1025_v20 = vsel %vm1024_vm9, %v1022_v18, %v952_v5 }
 0x15c   : > { %v960_v7 = vpop.permute.xlu0 %959 }
 0x15d   : > { %v1028_v22 = vsel %vm1027_vm10, %v1025_v20, %v960_v7 }
 0x15f   : > { %v938_v9 = vpop.permute.xlu1 %937 }
 0x160   : > { %v968_v11 = vpop.permute.xlu0 %967  ;;  %v1020_v41 = vsel %vm1018_vm7, %v1017_v38, %v938_v9 }
 0x161   : > { %v1031_v23 = vsel %vm1030_vm11, %v1028_v22, %v968_v11 }
 0x163   : > { %v946_v16 = vpop.permute.xlu1 %945 }
 0x164   : > { %v976_v0 = vpop.permute.xlu0 %975  ;;  %v1023_v45 = vsel %vm1021_vm8, %v1020_v41, %v946_v16 }
 0x165   : > { %v1034_v24 = vsel %vm1033_vm12, %v1031_v23, %v976_v0 }
 0x167   : > { %v954_v19 = vpop.permute.xlu1 %953 }
 0x168   : > { %v984_v21 = vpop.permute.xlu0 %983  ;;  %v1026_v2 = vsel %vm1024_vm9, %v1023_v45, %v954_v19 }
 0x169   : > { %v1037_v26 = vsel %vm1036_vm13, %v1034_v24, %v984_v21 }
 0x16b   : > { %v962_v25 = vpop.permute.xlu1 %961 }
 0x16c   : > { %v992_v27 = vpop.permute.xlu0 %991  ;;  %v1029_v39 = vsel %vm1027_vm10, %v1026_v2, %v962_v25 }
 0x16d   : > { %v1040_v40 = vsel %vm1039_vm14, %v1037_v26, %v992_v27 }
 0x16e   : > { %1044 = vrot.lane.b32.xlu0 %v1040_v40, %s1389_s22 }
 0x16f   : > { %v970_v32 = vpop.permute.xlu1 %969 }
 0x170   : > { %v1032_v42 = vsel %vm1030_vm11, %v1029_v39, %v970_v32 }
 0x173   : > { %v978_v37 = vpop.permute.xlu1 %977 }
 0x174   : > { %v1035_v46 = vsel %vm1033_vm12, %v1032_v42, %v978_v37 }
 0x177   : > { %v986_v28 = vpop.permute.xlu1 %985 }
 0x178   : > { %v1038_v47 = vsel %vm1036_vm13, %v1035_v46, %v986_v28 }
 0x17b   : > { %v994_v48 = vpop.permute.xlu1 %993 }
 0x17c   : > { %v1041_v49 = vsel %vm1039_vm14, %v1038_v47, %v994_v48 }
 0x17d   : > { %1046 = vrot.lane.b32.xlu1 %v1041_v49, %s1389_s22 }
 0x1e0   : > { %v1045_v29 = vpop.permute.xlu0 %1044 }
 0x1e1   : > { %v1051_v44 = vsel %vm1050_vm15, %v1040_v40, %v1045_v29 }
 0x1e2   : > { %1054 = vst.msk [vmem:[%s152_s23] sm:$0xff] %vm1053_vm0, %v1051_v44 }
 0x1ef   : > { %v1047_v43 = vpop.permute.xlu1 %1046 }
 0x1f0   : > { %v1052_v50 = vsel %vm1050_vm15, %v1041_v49, %v1047_v43 }
 0x1f1   : > { %1055 = vst.msk [vmem:[%s152_s23 + $0x8] sm:$0xff] %vm1053_vm0, %v1052_v50 }
 0x1f2   : > { %1300 = shalt.err (!%p1297_p6)
}
 0x1f3   : > { %s1301_s3 = scalar_lea.hbm %s1713_s28, 256  ;;  %s1305_s12 = scalar_lea.hbm %s1762_s1, 2048 }
 0x1f4   : > { %p1302_p7 = scmp.ne.s32.totalorder %s1713_s28, %s1301_s3  ;;  %p1306_p12 = scmp.lt.s32.totalorder %s1713_s28, %s1762_s1 }
 0x1f5   : > { %p1307_p1 = scmp.lt.s32.totalorder %s1305_s12, %s1301_s3 }
 0x1f6   : > { %p1303_p10 = pnand %p1302_p7, %p1453_p9 }
 0x1f7   : > { %p1308_p8 = por %p1307_p1, %p1306_p12 }
 0x1f8   : > { %p1304_p4 = pneg %p1303_p10 }
 0x1fa   : > { %p1309_p13 = pnand %p1308_p8, %p1304_p4 }
 0x1fc   : > { %1312 = shalt.err (!%p1309_p13)
}
 0x1fd   : > { %s1391_s22 = smov 128  }
 0x1fe   : > { %1178 = dma.vmem_to_hbm [thread:$0]  (%p1453_p9), %s1708_s18, 256, %s1713_s28, %s1057_s29, %s1391_s22, %s1391_s22, %s1377_s26  }
 0x1ff PF: > { %p1189_p0 = scmp.ge.s32.totalorder %s1367_s11, 2  ;;  %s1087_s23 = sand.u32 1, %s1347_s6  }
 0x200   : > { %s1088_s24 = scalar_lea.sflag [#allocation4], %s1087_s23 }
 0x201   : > { %p1185_p2 = pnand %p1189_p0, %p1460_p11 }
 0x203   : > { %p1186_p3 = pneg %p1185_p2 }
 0x205   : > { %1342 = dma.done.wait (%p1186_p3), %s1088_s24, 256  }
 0x206   : > { %1344 = vsyncadd (%p1186_p3), %s1088_s24, 4294967040  ;;  %s17_s11 = sadd.s32 1, %s1367_s11   ;;  %s1768_s6 = smov %s1351_s7 }
 0x207   : > { %p14_p5 = scmp.ge.s32.totalorder %s17_s11, 10   ;;  %s1769_s7 = smov %s1355_s8 }
 0x208   : > { %s1770_s8 = smov %s1458_s20  ;;  %s1771_s9 = smov %s1363_s10 }
 0x209   : > { %s1772_s10 = smov %s1774_s14  ;;  %16 = sbr.rel (!%p14_p5) target bundleno = 6 (0x6), region = 69 }
 0x20e   :  { %1093 = vsyncpa [#allocation3], 1 }
 0x20f   :  { %1095 = vsyncpa [#allocation3 + $0x1], 1 }
 0x210   :  { %1096 = vsyncpa [#allocation4], 1 }
 0x211   :  { %1098 = vsyncpa [#allocation4 + $0x1], 1 }

</bundles_post_ra>
